<compile_context>
chip_gen: v7x
topology: tpu7x:2x2x1
jax: 0.10.0
libtpu: 0.0.40
codegen_flags: <defaults>
</compile_context>

<pallas_src>
import jax
import jax.numpy as jnp
import numpy as np
from jax.experimental import pallas as pl
from jax.experimental.pallas import tpu as pltpu

L = 24            # input sequence length
C_OUT = 16        # conv output channels
K = 3             # conv kernel size
P_OUT = 12        # adaptive pool output size
FC_OUT = 12       # final output size
LP = L + 2        # conv pad=1 on each side
HID = L * C_OUT   # 384 — lane-dense hidden width (conv output in (l, c) layout)


def _cnn_forecast_kernel(xpad_ref, w1_ref, b1_ref, w2_ref, b2_ref, out_ref):
    # xpad_ref : (TB, LP)       zero-padded inputs, batch on the M/sublane dim
    # w1_ref   : (LP, HID)      conv weight folded into a banded matrix (exact)
    # b1_ref   : (1, HID)       conv bias laid out to match h's (l, c) flattening
    # w2_ref   : (HID, FC_OUT)  pool matrix + fc weight folded (both linear, post-ReLU)
    # b2_ref   : (1, FC_OUT)
    # out_ref  : (TB, FC_OUT)
    h = jnp.dot(xpad_ref[...], w1_ref[...], preferred_element_type=jnp.float32)
    h = jnp.maximum(h + b1_ref[...], 0.0)                       # conv -> bias -> ReLU
    o = jnp.dot(h, w2_ref[...], preferred_element_type=jnp.float32)
    out_ref[...] = o + b2_ref[...]                              # pool+fc folded, + fc bias


def _adaptive_avg_pool_matrix(in_len, out_len):
    """Exact AdaptiveAvgPool1d as a (out_len, in_len) averaging matrix."""
    P = np.zeros((out_len, in_len), dtype=np.float32)
    for i in range(out_len):
        start = (i * in_len) // out_len
        end = -((-(i + 1) * in_len) // out_len)  # ceil
        P[i, start:end] = 1.0 / (end - start)
    return P


_POOL_MAT = jnp.asarray(_adaptive_avg_pool_matrix(L, P_OUT))    # (12, 24), constant

# Constant band-selection tensor: E[k, l+k, l] = 1  (encodes the k=3, pad=1 conv taps)
_E = np.zeros((K, LP, L), dtype=np.float32)
for _k in range(K):
    for _l in range(L):
        _E[_k, _l + _k, _l] = 1.0
_BAND = jnp.asarray(_E)


def _fold_weights(conv_w, conv_b, fc_w, fc_b):
    # W1[p, l*C_OUT + c] = conv_w[c, 0, p - l]   (0 outside the 3-tap band)
    w1 = jnp.einsum("kpl,ck->plc", _BAND, conv_w[:, 0, :]).reshape(LP, HID)
    # b1[l*C_OUT + c] = conv_b[c]
    b1 = jnp.tile(conv_b[None, :], (L, 1)).reshape(1, HID)
    # PyTorch flatten is channel-major: flat[c*P_OUT + j].
    # W2[l*C_OUT + c, d] = sum_j pool[j, l] * fc_w[d, c*P_OUT + j]
    fc_w3 = fc_w.reshape(FC_OUT, C_OUT, P_OUT)
    w2 = jnp.einsum("jl,dcj->lcd", _POOL_MAT, fc_w3).reshape(HID, FC_OUT)
    b2 = fc_b.reshape(1, FC_OUT)
    return w1, b1, w2, b2


def init_params(key):
    """Deterministic parameter init matching the PyTorch module's shapes."""
    k1, k2, k3, k4 = jax.random.split(key, 4)
    conv_w = jax.random.normal(k1, (C_OUT, 1, K), jnp.float32) * 0.1
    conv_b = jax.random.normal(k2, (C_OUT,), jnp.float32) * 0.1
    fc_w = jax.random.normal(k3, (FC_OUT, C_OUT * P_OUT), jnp.float32) * 0.1
    fc_b = jax.random.normal(k4, (FC_OUT,), jnp.float32) * 0.1
    return conv_w, conv_b, fc_w, fc_b


@jax.jit
def cnn_forecast(x, conv_w, conv_b, fc_w, fc_b):
    """x: (B, 1, L) float32  ->  (B, 12) float32."""
    B = x.shape[0]
    assert x.shape == (B, 1, L)

    # zero-pad the sequence once (conv pad=1); input is read exactly once (no im2col)
    xpad = jnp.pad(x[:, 0, :], ((0, 0), (1, 1)))                # (B, LP)

    # Batch tile: multiple of 256 (v6e/v7x MXU rows; also a multiple of 128 for v5e)
    # when B is large, otherwise one 8-aligned tile.  Several grid steps when B is
    # large so the "parallel" axis shards across v7x's two TensorCores.
    if B >= 2048:
        TB = 1024
    elif B >= 256:
        TB = 256
    else:
        TB = ((B + 7) // 8) * 8
    B_pad = ((B + TB - 1) // TB) * TB
    if B_pad != B:
        xpad = jnp.pad(xpad, ((0, B_pad - B), (0, 0)))

    w1, b1, w2, b2 = _fold_weights(conv_w, conv_b, fc_w, fc_b)

    grid = (B_pad // TB,)
    flops = 2 * B_pad * (LP * HID + HID * FC_OUT)
    bytes_accessed = 4 * (B_pad * (LP + FC_OUT)
                          + LP * HID + HID + HID * FC_OUT + FC_OUT)

    out = pl.pallas_call(
        _cnn_forecast_kernel,
        out_shape=jax.ShapeDtypeStruct((B_pad, FC_OUT), jnp.float32),
        grid=grid,
        in_specs=[
            pl.BlockSpec((TB, LP), lambda i: (i, 0)),           # inputs (per batch tile)
            pl.BlockSpec((LP, HID), lambda i: (0, 0)),          # folded conv weight
            pl.BlockSpec((1, HID), lambda i: (0, 0)),           # conv bias (broadcast)
            pl.BlockSpec((HID, FC_OUT), lambda i: (0, 0)),      # folded pool+fc weight
            pl.BlockSpec((1, FC_OUT), lambda i: (0, 0)),        # fc bias (broadcast)
        ],
        out_specs=pl.BlockSpec((TB, FC_OUT), lambda i: (i, 0)),
        compiler_params=pltpu.CompilerParams(dimension_semantics=("parallel",)),
        cost_estimate=pl.CostEstimate(flops=flops, transcendentals=0,
                                      bytes_accessed=bytes_accessed),
    )(xpad, w1, b1, w2, b2)
    return out[:B]


def _reference(x, conv_w, conv_b, fc_w, fc_b):
    """Pure-JAX reference mirroring the PyTorch forward exactly."""
    xs = x[:, 0, :]
    x_pad = jnp.pad(xs, ((0, 0), (1, 1)))
    patches = jnp.stack([x_pad[:, k:k + L] for k in range(K)], axis=-1)    # (B, L, K)
    conv = jnp.einsum("blk,ck->bcl", patches, conv_w[:, 0, :]) + conv_b[None, :, None]
    conv = jnp.maximum(conv, 0.0)                                          # (B, C, L)
    P = _POOL_MAT
    pooled = jnp.einsum("bcl,jl->bcj", conv, P)                            # (B, C, 12)
    flat = pooled.reshape(x.shape[0], -1)                                  # channel-major
    return flat @ fc_w.T + fc_b


if __name__ == "__main__":
    key = jax.random.PRNGKey(0)
    kx, kp = jax.random.split(key)
    B = 2
    x = jax.random.normal(kx, (B, 1, L), jnp.float32)
    conv_w, conv_b, fc_w, fc_b = init_params(kp)

    out = cnn_forecast(x, conv_w, conv_b, fc_w, fc_b)
    out = jax.block_until_ready(out)

    ref = _reference(x, conv_w, conv_b, fc_w, fc_b)
    assert out.shape == (B, FC_OUT)
    np.testing.assert_allclose(np.asarray(out), np.asarray(ref), rtol=1e-4, atol=1e-4)
    print("KERNEL_OK")
</pallas_src>

<mosaic_0001>
module attributes {stable_mosaic.version = 11 : i64} {
  func.func @_cnn_forecast_kernel(%arg0: i32, %arg1: memref<8x26xf32, #tpu.memory_space<vmem>>, %arg2: memref<26x384xf32, #tpu.memory_space<vmem>>, %arg3: memref<1x384xf32, #tpu.memory_space<vmem>>, %arg4: memref<384x12xf32, #tpu.memory_space<vmem>>, %arg5: memref<1x12xf32, #tpu.memory_space<vmem>>, %arg6: memref<8x12xf32, #tpu.memory_space<vmem>>) attributes {dimension_semantics = [#tpu.dimension_semantics<parallel>], iteration_bounds = array<i64: 1>, scalar_prefetch = 0 : i64, scratch_operands = 0 : i64, tpu.core_type = #tpu.core_type<tc>, window_params = [{transform_indices = @transform_0, window_bounds = array<i64: 8, 26>}, {pipeline_mode = #tpu.pipeline_mode<synchronous>, transform_indices = @transform_1, window_bounds = array<i64: 26, 384>}, {pipeline_mode = #tpu.pipeline_mode<synchronous>, transform_indices = @transform_2, window_bounds = array<i64: 1, 384>}, {pipeline_mode = #tpu.pipeline_mode<synchronous>, transform_indices = @transform_3, window_bounds = array<i64: 384, 12>}, {pipeline_mode = #tpu.pipeline_mode<synchronous>, transform_indices = @transform_4, window_bounds = array<i64: 1, 12>}, {transform_indices = @transform_5, window_bounds = array<i64: 8, 12>}]} {
    %c0 = arith.constant 0 : index
    %c0_0 = arith.constant 0 : index
    %0 = vector.load %arg1[%c0, %c0_0] : memref<8x26xf32, #tpu.memory_space<vmem>>, vector<8x26xf32>
    %c0_1 = arith.constant 0 : index
    %c0_2 = arith.constant 0 : index
    %1 = vector.load %arg2[%c0_1, %c0_2] : memref<26x384xf32, #tpu.memory_space<vmem>>, vector<26x384xf32>
    %cst = arith.constant dense<0.000000e+00> : vector<8x384xf32>
    %2 = tpu.matmul %0, %1, %cst {dimension_numbers = #tpu.dot_dimension_numbers<[1], [0], [0], [1], [0, 0, 1, 1], [], []>} : vector<8x26xf32>, vector<26x384xf32>, vector<8x384xf32> -> vector<8x384xf32>
    %c0_3 = arith.constant 0 : index
    %c0_4 = arith.constant 0 : index
    %3 = vector.load %arg3[%c0_3, %c0_4] : memref<1x384xf32, #tpu.memory_space<vmem>>, vector<1x384xf32>
    %4 = vector.broadcast %3 : vector<1x384xf32> to vector<8x384xf32>
    %5 = arith.addf %2, %4 : vector<8x384xf32>
    %cst_5 = arith.constant 0.000000e+00 : f32
    %6 = vector.broadcast %cst_5 : f32 to vector<8x384xf32>
    %7 = arith.maximumf %5, %6 : vector<8x384xf32>
    %c0_6 = arith.constant 0 : index
    %c0_7 = arith.constant 0 : index
    %8 = vector.load %arg4[%c0_6, %c0_7] : memref<384x12xf32, #tpu.memory_space<vmem>>, vector<384x12xf32>
    %cst_8 = arith.constant dense<0.000000e+00> : vector<8x12xf32>
    %9 = tpu.matmul %7, %8, %cst_8 {dimension_numbers = #tpu.dot_dimension_numbers<[1], [0], [0], [1], [0, 0, 1, 1], [], []>} : vector<8x384xf32>, vector<384x12xf32>, vector<8x12xf32> -> vector<8x12xf32>
    %c0_9 = arith.constant 0 : index
    %c0_10 = arith.constant 0 : index
    %10 = vector.load %arg5[%c0_9, %c0_10] : memref<1x12xf32, #tpu.memory_space<vmem>>, vector<1x12xf32>
    %11 = vector.broadcast %10 : vector<1x12xf32> to vector<8x12xf32>
    %12 = arith.addf %9, %11 : vector<8x12xf32>
    %c0_11 = arith.constant 0 : index
    %c0_12 = arith.constant 0 : index
    %13 = vector.load %arg6[%c0_11, %c0_12] : memref<8x12xf32, #tpu.memory_space<vmem>>, vector<8x12xf32>
    tpu.vector_store %arg6[%c0_11, %c0_12], %12 {strides = array<i32>} : memref<8x12xf32, #tpu.memory_space<vmem>>, vector<8x12xf32>,
    return
  }
  func.func @transform_0(%arg0: i32) -> (i32, i32) {
    %c0_i32 = arith.constant 0 : i32
    %c0_i32_0 = arith.constant 0 : i32
    return %arg0, %c0_i32 : i32, i32
  }
  func.func @transform_1(%arg0: i32) -> (i32, i32) {
    %c0_i32 = arith.constant 0 : i32
    %c0_i32_0 = arith.constant 0 : i32
    %c0_i32_1 = arith.constant 0 : i32
    return %c0_i32, %c0_i32_0 : i32, i32
  }
  func.func @transform_2(%arg0: i32) -> (i32, i32) {
    %c0_i32 = arith.constant 0 : i32
    %c0_i32_0 = arith.constant 0 : i32
    %c0_i32_1 = arith.constant 0 : i32
    return %c0_i32, %c0_i32_0 : i32, i32
  }
  func.func @transform_3(%arg0: i32) -> (i32, i32) {
    %c0_i32 = arith.constant 0 : i32
    %c0_i32_0 = arith.constant 0 : i32
    %c0_i32_1 = arith.constant 0 : i32
    return %c0_i32, %c0_i32_0 : i32, i32
  }
  func.func @transform_4(%arg0: i32) -> (i32, i32) {
    %c0_i32 = arith.constant 0 : i32
    %c0_i32_0 = arith.constant 0 : i32
    %c0_i32_1 = arith.constant 0 : i32
    return %c0_i32, %c0_i32_0 : i32, i32
  }
  func.func @transform_5(%arg0: i32) -> (i32, i32) {
    %c0_i32 = arith.constant 0 : i32
    %c0_i32_0 = arith.constant 0 : i32
    return %arg0, %c0_i32 : i32, i32
  }
}

</mosaic_0001>

<bundles_post_ra>
// kernel: tile.6
= control target key start
LH: loop header
LB: loop body
LE: loop exit
PB: predicated region body
PF: predicated region fallthrough
CT: control target
= control target key end

     0   :  { %s34_s0 = inlined_call_operand.vmem [shape: f32[16], index: 0, kind: input, shape index: {}]   ;;  %s35_s1 = inlined_call_operand.vmem [shape: f32[24,1,1,16], index: 1, kind: output, shape index: {}]  }
   0x1   :  { %v4_v0 = vld [vmem:[%s34_s0] ss:$0 sm:$0xff] }
   0x2   :  { %5 = vst [vmem:[%s35_s1] sm:$0xff] %v4_v0  ;;  %10 = vst [vmem:[%s35_s1 + $0x8] sm:$0xff] %v4_v0 }
   0x3   :  { %11 = vst [vmem:[%s35_s1 + $0x10] sm:$0xff] %v4_v0 }

// kernel: tile.7
= control target key start
LH: loop header
LB: loop body
LE: loop exit
PB: predicated region body
PF: predicated region fallthrough
CT: control target
= control target key end

     0   :  { %s81_s8 = smov 112   ;;  %s82_s11 = smov 80   ;;  %vm3_vm0 = vcmask 130048   ;;  %vm9_vm1 = vcmask 1048448   ;;  %vm15_vm2 = vcmask 917248   ;;  %vm21_vm3 = vcmask 786048   ;;  %s131_s0 = inlined_call_operand.vmem [shape: f32[24,1,1,16], index: 0, kind: input, shape index: {}]   ;;  %s132_s1 = inlined_call_operand.vmem [shape: f32[1,384], index: 1, kind: output, shape index: {}]  }
   0x1   :  { %v65_v0 = vld [vmem:[%s131_s0 + $0x7] ss:$8 sm:$0x7]   ;;  %v67_v1 = vld [vmem:[%s131_s0 + $0x5] ss:$8 sm:$0x7]  }
   0x2   :  { %7 = vrot.lane.b32.xlu0 %v65_v0, %s81_s8  ;;  %19 = vrot.lane.b32.xlu1 %v67_v1, %s82_s11  ;;  %v66_v2 = vld [vmem:[%s131_s0 + $0x6] ss:$8 sm:$0x7]   ;;  %v68_v3 = vld [vmem:[%s131_s0 + $0x4] ss:$8 sm:$0x7]  }
   0x3   :  { %s83_s16 = smov 96   ;;  %v2_v4 = vld [vmem:[%s131_s0] ss:$8 sm:$0x7]   ;;  %s84_s19 = smov 64   ;;  %vm27_vm4 = vcmask 654848  }
   0x4   :  { %v69_v5 = vld [vmem:[%s131_s0 + $0x3] ss:$8 sm:$0x7]   ;;  %4 = vst.msk [vmem:[#allocation0] ss:$8 sm:$0x7] %vm3_vm0, %v2_v4  }
   0x5   :  { %v70_v6 = vld [vmem:[%s131_s0 + $0x2] ss:$8 sm:$0x7]   ;;  %s85_s24 = smov 48   ;;  %s86_s25 = smov 32   ;;  %vm33_vm5 = vcmask 523648  }
   0x6   :  { %13 = vrot.lane.b32.xlu0 %v66_v2, %s83_s16  ;;  %25 = vrot.lane.b32.xlu1 %v68_v3, %s84_s19  ;;  %v71_v7 = vld [vmem:[%s131_s0 + $0x1] ss:$8 sm:$0x7]   ;;  %s87_s0 = smov 16   ;;  %vm39_vm6 = vcmask 392448   ;;  %vm45_vm7 = vcmask 261248  }
   0xa   :  { %31 = vrot.lane.b32.xlu0 %v69_v5, %s85_s24  ;;  %37 = vrot.lane.b32.xlu1 %v70_v6, %s86_s25 }
   0xe   :  { %43 = vrot.lane.b32.xlu0 %v71_v7, %s87_s0 }
  0x74   :  { %v8_v8 = vpop.permute.xlu0 %7   ;;  %v20_v9 = vpop.permute.xlu1 %19  }
  0x75   :  { %10 = vst.msk [vmem:[#allocation0] ss:$8 sm:$0x7] %vm9_vm1, %v8_v8  }
  0x78   :  { %v14_v10 = vpop.permute.xlu0 %13   ;;  %v26_v11 = vpop.permute.xlu1 %25  }
  0x79   :  { %16 = vst.msk [vmem:[#allocation0] ss:$8 sm:$0x7] %vm15_vm2, %v14_v10  }
  0x7a   :  { %22 = vst.msk [vmem:[#allocation0] ss:$8 sm:$0x7] %vm21_vm3, %v20_v9  }
  0x7b   :  { %28 = vst.msk [vmem:[#allocation0] ss:$8 sm:$0x7] %vm27_vm4, %v26_v11  }
  0x7c   :  { %v32_v12 = vpop.permute.xlu0 %31   ;;  %v38_v13 = vpop.permute.xlu1 %37  }
  0x7d   :  { %34 = vst.msk [vmem:[#allocation0] ss:$8 sm:$0x7] %vm33_vm5, %v32_v12  }
  0x7e   :  { %40 = vst.msk [vmem:[#allocation0] ss:$8 sm:$0x7] %vm39_vm6, %v38_v13  }
  0x80   :  { %v44_v14 = vpop.permute.xlu0 %43  }
  0x81   :  { %46 = vst.msk [vmem:[#allocation0] ss:$8 sm:$0x7] %vm45_vm7, %v44_v14  }
  0x88   :  { %v50_v15 = vld [vmem:[#allocation0] sm:$0x1]  ;;  %v54_v16 = vld [vmem:[#allocation0 + $0x8] sm:$0x1]  ;;  %v59_v17 = vld [vmem:[#allocation0 + $0x10] sm:$0x1] }
  0x89   :  { %52 = vst [vmem:[%s132_s1] sm:$0x1] %v50_v15  ;;  %72 = vst [vmem:[%s132_s1 + $0x1] sm:$0x1] %v54_v16 }
  0x8a   :  { %73 = vst [vmem:[%s132_s1 + $0x2] sm:$0x1] %v59_v17 }

// kernel: cnn_forecast.1
= control target key start
LH: loop header
LB: loop body
LE: loop exit
PB: predicated region body
PF: predicated region fallthrough
CT: control target
= control target key end

     0   :  { %vm54_vm0 = vcmask 1041408   ;;  %v595_v3 = vmov 0.0|0.0   ;;  %v596_v4 = vmov 0.0   ;;  %vm597_vm1 = vmmov 0   ;;  %s849_s1 = inlined_call_operand.vmem [shape: f32[26,384], index: 1, kind: input, shape index: {}]   ;;  %s850_s3 = inlined_call_operand.vmem [shape: f32[384,12], index: 3, kind: input, shape index: {}]   ;;  %s851_s0 = inlined_call_operand.vmem [shape: f32[8,26], index: 0, kind: input, shape index: {}]   ;;  %s852_s2 = inlined_call_operand.vmem [shape: f32[1,384], index: 2, kind: input, shape index: {}]   ;;  %s853_s4 = inlined_call_operand.vmem [shape: f32[1,12], index: 4, kind: input, shape index: {}]   ;;  %s854_s5 = inlined_call_operand.vmem [shape: f32[8,12], index: 5, kind: output, shape index: {}]  }
   0x1   :  { %v22_v0 = vld [vmem:[%s849_s1 + $0x8] sm:$0xff]  ;;  %v25_v1 = vld [vmem:[%s849_s1 + $0x20] sm:$0xff]  ;;  %528 = vmatprep.subr.bf16.mxu1 %v595_v3  ;;  %128 = vmatprep.mubr.f32.mxu0 %v596_v4  ;;  %v24_v6 = vld [vmem:[%s849_s1 + $0x18] sm:$0xff]  ;;  %vm598_vm2 = vmmov 1   ;;  %vm50_vm4 = vcmask 211968   ;;  %vm403_vm5 = vcmask 97280  }
   0x2   :  { %v21_v2 = vld [vmem:[%s849_s1] sm:$0xff]  ;;  %v518_v5 = vpack.c.bf16 %v25_v1, %v22_v0  ;;  %v28_v7 = vld [vmem:[%s849_s1 + $0x38] sm:$0xff]  ;;  %v31_v8 = vld [vmem:[%s849_s1 + $0x50] sm:$0x3]  ;;  %480 = vmatprep.mubr.msk.f32.mxu1 %vm597_vm1, %v596_v4 }
   0x3   :  { %v520_v9 = vpack.c.bf16 %v24_v6, %v21_v2  ;;  %v522_v10 = vpack.c.bf16 %v31_v8, %v28_v7  ;;  %vm652_vm3 = vmpackc.low %vm54_vm0, %vm598_vm2  ;;  %v27_v12 = vld [vmem:[%s849_s1 + $0x30] sm:$0xff]  ;;  %v30_v13 = vld [vmem:[%s849_s1 + $0x48] sm:$0x3] }
   0x4   :  { %519 = vmatprep.subr.bf16.mxu0 %v518_v5  ;;  %v23_v14 = vld [vmem:[%s849_s1 + $0x10] sm:$0xff]  ;;  %v26_v15 = vld [vmem:[%s849_s1 + $0x28] sm:$0xff]  ;;  %v525_v16 = vpack.c.bf16 %v30_v13, %v27_v12  ;;  %v29_v18 = vld [vmem:[%s849_s1 + $0x40] sm:$0xff] }
   0x5   :  { %521 = vmatpush1.bf16.msra.mxu0 %v520_v9  ;;  %v529_v17 = vpack.c.bf16 %v26_v15, %v23_v14  ;;  %v32_v19 = vld [vmem:[%s849_s1 + $0x58] sm:$0x3]  ;;  %v224_v20 = vld [vmem:[%s850_s3 + $0x80] sm:$0xff]  ;;  %v225_v21 = vld [vmem:[%s850_s3 + $0x88] sm:$0xff] }
   0x6   :  { %524 = vmatprep.subr.msk.bf16.mxu0 %vm652_vm3, %v522_v10  ;;  %v208_v22 = vld [vmem:[%s850_s3] sm:$0xff]  ;;  %v209_v23 = vld [vmem:[%s850_s3 + $0x8] sm:$0xff]  ;;  %v532_v24 = vpack.c.bf16 %v32_v19, %v29_v18  ;;  %v535_v25 = vpack.c.bf16 %v225_v21, %v224_v20  ;;  %v226_v26 = vld [vmem:[%s850_s3 + $0x90] sm:$0xff] }
   0x7   :  { %530 = vmatpush3.bf16.msra.mxu1 %v529_v17  ;;  %v227_v27 = vld [vmem:[%s850_s3 + $0x98] sm:$0xff]  ;;  %v240_v28 = vld [vmem:[%s850_s3 + $0x100] sm:$0xff]  ;;  %v241_v29 = vld [vmem:[%s850_s3 + $0x108] sm:$0xff]  ;;  %v537_v31 = vpack.c.bf16 %v209_v23, %v208_v22 }
   0x8   :  { %531 = vmatprep.subr.bf16.mxu1 %v595_v3  ;;  %v20_v30 = vld [vmem:[%s851_s0] sm:$0xff]  ;;  %v539_v32 = vpack.c.bf16 %v227_v27, %v226_v26  ;;  %v210_v33 = vld [vmem:[%s850_s3 + $0x10] sm:$0xff]  ;;  %v211_v34 = vld [vmem:[%s850_s3 + $0x18] sm:$0xff]  ;;  %v568_v35 = vpack.c.bf16 %v241_v29, %v240_v28 }
   0x9   :  { %527 = vmatpush1.bf16.msk.msra.mxu0 %vm652_vm3, %v525_v16  ;;  %v228_v36 = vld [vmem:[%s850_s3 + $0xa0] sm:$0xff]  ;;  %v229_v37 = vld [vmem:[%s850_s3 + $0xa8] sm:$0xff]  ;;  %v242_v38 = vld [vmem:[%s850_s3 + $0x110] sm:$0xff]  ;;  %v541_v40 = vpack.c.bf16 %v211_v34, %v210_v33 }
   0xa   :  { %536 = vmatprep.subr.bf16.mxu0 %v535_v25  ;;  %v243_v39 = vld [vmem:[%s850_s3 + $0x118] sm:$0xff]  ;;  %v543_v41 = vpack.c.bf16 %v229_v37, %v228_v36  ;;  %v212_v42 = vld [vmem:[%s850_s3 + $0x20] sm:$0xff]  ;;  %v213_v43 = vld [vmem:[%s850_s3 + $0x28] sm:$0xff] }
   0xb   :  { %534 = vmatpush3.bf16.msk.msra.mxu1 %vm652_vm3, %v532_v24  ;;  %v571_v44 = vpack.c.bf16 %v243_v39, %v242_v38  ;;  %v230_v45 = vld [vmem:[%s850_s3 + $0xb0] sm:$0xff]  ;;  %v231_v46 = vld [vmem:[%s850_s3 + $0xb8] sm:$0xff]  ;;  %v244_v47 = vld [vmem:[%s850_s3 + $0x120] sm:$0xff]  ;;  %v545_v49 = vpack.c.bf16 %v213_v43, %v212_v42 }
   0xc   :  { %411 = vmatmul.mubr.msk.f32.vlgmr.msra.gmra.mrb[0].mxu0 %vm50_vm4, %v20_v30  ;;  %567 = vmatprep.subr.bf16.mxu1 %v595_v3  ;;  %v245_v48 = vld [vmem:[%s850_s3 + $0x128] sm:$0xff]  ;;  %v547_v50 = vpack.c.bf16 %v231_v46, %v230_v45  ;;  %v214_v51 = vld [vmem:[%s850_s3 + $0x30] sm:$0xff]  ;;  %v215_v52 = vld [vmem:[%s850_s3 + $0x38] sm:$0xff] }
   0xd   :  { %538 = vmatpush3.bf16.msra.mxu0 %v537_v31  ;;  %v574_v53 = vpack.c.bf16 %v245_v48, %v244_v47  ;;  %v232_v54 = vld [vmem:[%s850_s3 + $0xc0] sm:$0xff]  ;;  %v233_v55 = vld [vmem:[%s850_s3 + $0xc8] sm:$0xff]  ;;  %v246_v56 = vld [vmem:[%s850_s3 + $0x130] sm:$0xff]  ;;  %v549_v58 = vpack.c.bf16 %v215_v52, %v214_v51  ;;  %v35_v31 = vlaneseq }
   0xe   :  { %481 = vmatmul.mubr.msk.f32.vlgmr.msra.gmra.mrb[0].mxu1 %vm50_vm4, %v20_v30  ;;  %540 = vmatprep.subr.bf16.mxu0 %v539_v32  ;;  %v247_v57 = vld [vmem:[%s850_s3 + $0x138] sm:$0xff]  ;;  %v551_v59 = vpack.c.bf16 %v233_v55, %v232_v54  ;;  %v216_v60 = vld [vmem:[%s850_s3 + $0x40] sm:$0xff]  ;;  %v217_v61 = vld [vmem:[%s850_s3 + $0x48] sm:$0xff] }
   0xf   :  { %569 = vmatpush3.bf16.msra.mxu1 %v568_v35  ;;  %515 = vmatprep.mubr.msk.f32.mxu1 %vm597_vm1, %v596_v4  ;;  %v577_v62 = vpack.c.bf16 %v247_v57, %v246_v56  ;;  %v234_v63 = vld [vmem:[%s850_s3 + $0xd0] sm:$0xff]  ;;  %v235_v0 = vld [vmem:[%s850_s3 + $0xd8] sm:$0xff]  ;;  %v248_v1 = vld [vmem:[%s850_s3 + $0x140] sm:$0xff]  ;;  %v553_v4 = vpack.c.bf16 %v217_v61, %v216_v60  ;;  %v36_v32 = vshrl.u32 %v35_v31, 7 }
  0x10   :  { %570 = vmatprep.subr.bf16.mxu1 %v595_v3  ;;  %v249_v2 = vld [vmem:[%s850_s3 + $0x148] sm:$0xff]  ;;  %v555_v5 = vpack.c.bf16 %v235_v0, %v234_v63  ;;  %v218_v6 = vld [vmem:[%s850_s3 + $0x50] sm:$0xff]  ;;  %v219_v7 = vld [vmem:[%s850_s3 + $0x58] sm:$0xff] }
  0x11   :  { %542 = vmatpush3.bf16.msra.mxu0 %v541_v40  ;;  %v580_v8 = vpack.c.bf16 %v249_v2, %v248_v1  ;;  %v236_v9 = vld [vmem:[%s850_s3 + $0xe0] sm:$0xff]  ;;  %v237_v10 = vld [vmem:[%s850_s3 + $0xe8] sm:$0xff]  ;;  %v557_v11 = vpack.c.bf16 %v219_v7, %v218_v6  ;;  %v250_v15 = vld [vmem:[%s850_s3 + $0x150] sm:$0xff]  ;;  %v37_v33 = vsub.s32 0, %v36_v32  ;;  %v41_v35 = vsub.s32 1, %v36_v32 }
  0x12   :  { %544 = vmatprep.subr.bf16.mxu0 %v543_v41  ;;  %v559_v12 = vpack.c.bf16 %v237_v10, %v236_v9  ;;  %v220_v13 = vld [vmem:[%s850_s3 + $0x60] sm:$0xff]  ;;  %v221_v14 = vld [vmem:[%s850_s3 + $0x68] sm:$0xff]  ;;  %v251_v17 = vld [vmem:[%s850_s3 + $0x158] sm:$0xff]  ;;  %v45_v36 = vsub.s32 2, %v36_v32 }
  0x13   :  { %572 = vmatpush3.bf16.msra.mxu1 %v571_v44  ;;  %v561_v16 = vpack.c.bf16 %v221_v14, %v220_v13  ;;  %v583_v18 = vpack.c.bf16 %v251_v17, %v250_v15  ;;  %v238_v19 = vld [vmem:[%s850_s3 + $0xf0] sm:$0xff]  ;;  %v239_v20 = vld [vmem:[%s850_s3 + $0xf8] sm:$0xff]  ;;  %v252_v24 = vld [vmem:[%s850_s3 + $0x160] sm:$0xff] }
  0x14   :  { %573 = vmatprep.subr.bf16.mxu1 %v595_v3  ;;  %v563_v21 = vpack.c.bf16 %v239_v20, %v238_v19  ;;  %v222_v22 = vld [vmem:[%s850_s3 + $0x70] sm:$0xff]  ;;  %v223_v23 = vld [vmem:[%s850_s3 + $0x78] sm:$0xff]  ;;  %v253_v26 = vld [vmem:[%s850_s3 + $0x168] sm:$0xff] }
  0x15   :  { %546 = vmatpush3.bf16.msra.mxu0 %v545_v49  ;;  %v565_v25 = vpack.c.bf16 %v223_v23, %v222_v22  ;;  %v586_v27 = vpack.c.bf16 %v253_v26, %v252_v24  ;;  %v254_v28 = vld [vmem:[%s850_s3 + $0x170] sm:$0xff]  ;;  %v255_v29 = vld [vmem:[%s850_s3 + $0x178] sm:$0xff]  ;;  %v33_v34 = vld [vmem:[%s852_s2] sm:$0x7] }
  0x16   :  { %548 = vmatprep.subr.bf16.mxu0 %v547_v50  ;;  %v589_v30 = vpack.c.bf16 %v255_v29, %v254_v28  ;;  %v38_v37 = vrot.slane %v33_v34, %v37_v33  ;;  %v42_v38 = vrot.slane %v33_v34, %v41_v35  ;;  %v46_v39 = vrot.slane %v33_v34, %v45_v36  ;;  %v414_v52 = vld [vmem:[%s853_s4] ss:$0 sm:$0xff] }
  0x17   :  { %575 = vmatpush3.bf16.msra.mxu1 %v574_v53 }
  0x18   :  { %576 = vmatprep.subr.bf16.mxu1 %v595_v3 }
  0x19   :  { %550 = vmatpush3.bf16.msra.mxu0 %v549_v58 }
  0x1a   :  { %552 = vmatprep.subr.bf16.mxu0 %v551_v59 }
  0x1b   :  { %578 = vmatpush3.bf16.msra.mxu1 %v577_v62 }
  0x1c   :  { %579 = vmatprep.subr.bf16.mxu1 %v595_v3 }
  0x1d   :  { %554 = vmatpush3.bf16.msra.mxu0 %v553_v4 }
  0x1e   :  { %556 = vmatprep.subr.bf16.mxu0 %v555_v5 }
  0x1f   :  { %581 = vmatpush3.bf16.msra.mxu1 %v580_v8 }
  0x20   :  { %582 = vmatprep.subr.bf16.mxu1 %v595_v3 }
  0x21   :  { %558 = vmatpush3.bf16.msra.mxu0 %v557_v11 }
  0x22   :  { %560 = vmatprep.subr.bf16.mxu0 %v559_v12 }
  0x23   :  { %584 = vmatpush3.bf16.msra.mxu1 %v583_v18 }
  0x24   :  { %585 = vmatprep.subr.bf16.mxu1 %v595_v3 }
  0x25   :  { %562 = vmatpush3.bf16.msra.mxu0 %v561_v16 }
  0x26   :  { %564 = vmatprep.subr.bf16.mxu0 %v563_v21 }
  0x27   :  { %587 = vmatpush3.bf16.msra.mxu1 %v586_v27 }
  0x28   :  { %588 = vmatprep.subr.bf16.mxu1 %v595_v3 }
  0x29   :  { %566 = vmatpush3.bf16.msra.mxu0 %v565_v25 }
  0x2b   :  { %590 = vmatpush3.bf16.msra.mxu1 %v589_v30 }
  0xdf   :  { %v130_v40 = vpop.f32.mrb[0].mxu0 }
  0xe0   :  { %v131_v41 = vadd.f32 %v130_v40, %v38_v37  ;;  %v132_v42 = vpop.f32.mrb[1].mxu0 }
  0xe1   :  { %v133_v43 = vadd.f32 %v132_v42, %v42_v38  ;;  %v201_v44 = vpop.f32.mrb[0].mxu1 }
  0xe2   :  { %v202_v3 = vadd.f32 %v201_v44, %v46_v39  ;;  %v482_v45 = vpop.f32.mrb[1].mxu1  ;;  %v205_v47 = vmax.f32 %v131_v41, 0.0 }
  0xe3   :  { %v206_v46 = vmax.f32 %v133_v43, 0.0 }
  0xe4   :  { %v207_v48 = vmax.f32 %v202_v3, 0.0 }
  0xe5   :  { %327 = vmatprep.mubr.f32.mxu0 %v206_v46 }
  0xe6   :  { %328 = vmatmul.mubr.f32.vlgmr.msra.gmra.mrb[2].mxu0 %v205_v47  ;;  %516 = vmatmul.mubr.f32.vlgmr.msra.gmra.mrb[2].mxu1 %v207_v48 }
 0x1b9   :  { %v452_v49 = vpop.f32.mrb[2].mxu0  ;;  %v399_v50 = vpop.f32.mrb[2].mxu1 }
 0x1ba   :  { %v453_v51 = vpop.f32.mrb[3].mxu0  ;;  %v517_v53 = vpop.f32.mrb[3].mxu1 }
 0x1bb   :  { %v454_v54 = vadd.f32 %v453_v51, %v452_v49 }
 0x1bd   :  { %v330_v55 = vadd.f32 %v454_v54, %v414_v52 }
 0x1bf   :  { %v400_v56 = vadd.f32 %v399_v50, %v330_v55 }
 0x1c1   :  { %404 = vst.msk [vmem:[%s854_s5] sm:$0xff] %vm403_vm5, %v400_v56 }

</bundles_post_ra>
